<compile_context>
chip_gen: v7x
topology: tpu7x:2x2x1
jax: 0.10.0
libtpu: 0.0.40
codegen_flags: <defaults>
</compile_context>

<pallas_src>
import functools

import jax
import jax.numpy as jnp
from jax.experimental import pallas as pl
from jax.experimental.pallas import tpu as pltpu


def _round_up(x, m):
    return (x + m - 1) // m * m


def _vpu_matmul(x, w):
    """Exact-f32 (R, K) @ (K, N) via VPU broadcast-multiply + reduce.

    Used when the row count is too small to amortize an MXU push/drain; keeps
    the kernel in exact f32 in both interpret and compiled modes.
    """
    return jnp.sum(x[:, :, None] * w[None, :, :], axis=1)


def _soft_dot_kernel(h_ref, ctx_ref, w_in_t_ref, w_out_t_ref,
                     h_tilde_ref, attn_ref):
    h = h_ref[...]                # (bm, D) f32
    ctx = ctx_ref[...]            # (bm, S, D) f32
    bm, d = h.shape

    # Static (trace-time) choice: only drive the MXU when there are enough rows
    # in the tile to fill it; at tiny row counts the VPU path avoids MXU drain
    # latency and stays exactly f32.
    use_mxu = bm >= 64

    # target = linear_in(h)   (no bias)
    if use_mxu:
        target = jnp.dot(h, w_in_t_ref[...],
                         preferred_element_type=jnp.float32)       # (bm, D)
    else:
        target = _vpu_matmul(h, w_in_t_ref[...])                    # (bm, D)

    # scores[b, s] = <ctx[b, s, :], target[b, :]>  — VPU multiply + lane reduce.
    # TODO(synk): at production sizes put this and the weighted-context
    # contraction back on the MXU (batched dot_general, f32 accumulate).
    scores = jnp.sum(ctx * target[:, None, :], axis=-1)             # (bm, S)

    # Numerically stable softmax over the sequence axis. Exact division (not
    # the approximate EUP reciprocal) because attn is a user-visible
    # probability output and must sum to 1.
    m = jnp.max(scores, axis=-1, keepdims=True)
    e = jnp.exp(scores - m)
    denom = jnp.sum(e, axis=-1, keepdims=True)
    attn = e / denom                                                # (bm, S)
    attn_ref[...] = attn.astype(attn_ref.dtype)

    # weighted_context[b, :] = sum_s attn[b, s] * ctx[b, s, :]
    wc = jnp.sum(attn[:, :, None] * ctx, axis=1)                    # (bm, D)

    # h_tilde = tanh(linear_out(cat([wc, h], -1))).  The concat is never
    # materialized: apply the two static halves of the pre-transposed output
    # weight and accumulate (static ref slices are free views).
    w_out_top = w_out_t_ref[0:d, :]        # (D, D) — multiplies wc
    w_out_bot = w_out_t_ref[d:2 * d, :]    # (D, D) — multiplies h
    if use_mxu:
        pre = jnp.dot(wc, w_out_top, preferred_element_type=jnp.float32)
        pre = pre + jnp.dot(h, w_out_bot, preferred_element_type=jnp.float32)
    else:
        pre = _vpu_matmul(wc, w_out_top) + _vpu_matmul(h, w_out_bot)
    h_tilde_ref[...] = jnp.tanh(pre).astype(h_tilde_ref.dtype)


def prepare_params(w_in, w_out):
    """Transpose the nn.Linear weights ONCE at parameter-load time.

    w_in : (D, D)   torch layout (out, in)  -> w_in_t  (D, D)  so target = h @ w_in_t
    w_out: (D, 2D)  torch layout (out, in)  -> w_out_t (2D, D) so pre = cat([wc,h]) @ w_out_t
    """
    return jnp.asarray(w_in).T, jnp.asarray(w_out).T


@functools.partial(jax.jit, static_argnames=("block_rows",))
def soft_dot_attention(h, context, w_in_t, w_out_t, *, block_rows=128):
    """h: (B, D), context: (B, S, D); w_in_t / w_out_t pre-transposed (see prepare_params).

    The leading axis is treated as a generic "row" axis — callers may fold many
    decode steps into it (rows = B * T) so one pallas_call amortizes launch and
    per-grid-step overhead across all of them.
    """
    B, D = h.shape
    Bc, S, Dc = context.shape
    assert (Bc, Dc) == (B, D)
    assert w_in_t.shape == (D, D) and w_out_t.shape == (2 * D, D)

    # Pad the row axis to a sublane multiple and tile it with the grid.
    bm = min(block_rows, _round_up(B, 8))
    Bp = _round_up(B, bm)
    if Bp != B:
        h = jnp.pad(h, ((0, Bp - B), (0, 0)))
        context = jnp.pad(context, ((0, Bp - B), (0, 0), (0, 0)))

    grid = (Bp // bm,)
    out_shape = (jax.ShapeDtypeStruct((Bp, D), h.dtype),
                 jax.ShapeDtypeStruct((Bp, S), h.dtype))

    # TODO(synk): at production sizes present lane-dense output slabs (last dim a
    # multiple of 128) and reshape outside the kernel to avoid masked vst.msk.
    h_tilde, attn = pl.pallas_call(
        _soft_dot_kernel,
        out_shape=out_shape,
        grid=grid,
        in_specs=[
            # Row tiles advance with the grid (auto double-buffered)...
            pl.BlockSpec((bm, D), lambda i: (i, 0)),
            pl.BlockSpec((bm, S, D), lambda i: (i, 0, 0)),
            # ...while the weights use constant block indices so they are DMA'd
            # once and stay resident in VMEM across all grid steps.
            pl.BlockSpec((D, D), lambda i: (0, 0)),
            pl.BlockSpec((2 * D, D), lambda i: (0, 0)),
        ],
        out_specs=(
            pl.BlockSpec((bm, D), lambda i: (i, 0)),
            pl.BlockSpec((bm, S), lambda i: (i, 0)),
        ),
        compiler_params=pltpu.CompilerParams(
            dimension_semantics=("parallel",)),   # shards row tiles across v7x's 2 TCs
    )(h, context, w_in_t, w_out_t)

    return h_tilde[:B], attn[:B]


def _reference(h, context, w_in, w_out):
    """Pure-JAX reference mirroring the PyTorch forward (default args), evaluated
    at HIGHEST matmul precision so it is comparable with the exact-f32 kernel."""
    hp = jax.lax.Precision.HIGHEST
    target = jnp.dot(h, w_in.T, precision=hp)                       # (B, D)
    scores = jnp.einsum('bsd,bd->bs', context, target, precision=hp)  # (B, S)
    attn = jax.nn.softmax(scores, axis=1)                           # (B, S)
    wc = jnp.einsum('bs,bsd->bd', attn, context, precision=hp)      # (B, D)
    cat = jnp.concatenate([wc, h], axis=1)                          # (B, 2D)
    h_tilde = jnp.tanh(jnp.dot(cat, w_out.T, precision=hp))         # (B, D)
    return h_tilde, attn


if __name__ == "__main__":
    B, S, D = 2, 8, 32  # batch, seq_len, image_hidden

    key = jax.random.PRNGKey(0)
    k_h, k_ctx, k_win, k_wout = jax.random.split(key, 4)

    h = jax.random.normal(k_h, (B, D), dtype=jnp.float32)
    context = jax.random.normal(k_ctx, (B, S, D), dtype=jnp.float32)

    # Deterministic synthetic parameters (torch nn.Linear weight layout: (out, in)).
    bound_in = 1.0 / (D ** 0.5)
    bound_out = 1.0 / ((2 * D) ** 0.5)
    w_in = jax.random.uniform(k_win, (D, D), jnp.float32, -bound_in, bound_in)
    w_out = jax.random.uniform(k_wout, (D, 2 * D), jnp.float32, -bound_out, bound_out)

    # Transposes happen once here (parameter-load time), not per forward call.
    w_in_t, w_out_t = prepare_params(w_in, w_out)
    w_in_t, w_out_t = jax.block_until_ready((w_in_t, w_out_t))

    h_tilde, attn = soft_dot_attention(h, context, w_in_t, w_out_t)
    jax.block_until_ready((h_tilde, attn))

    h_tilde_ref, attn_ref = _reference(h, context, w_in, w_out)

    assert h_tilde.shape == (B, D) and attn.shape == (B, S)
    # attn is a real probability distribution (exact division in the kernel).
    assert jnp.allclose(attn.sum(axis=-1), 1.0, atol=1e-5)
    assert jnp.allclose(attn, attn_ref, atol=1e-4, rtol=1e-4)
    assert jnp.allclose(h_tilde, h_tilde_ref, atol=1e-4, rtol=1e-4)

    print("KERNEL_OK")
</pallas_src>

<mosaic_0001>
module attributes {stable_mosaic.version = 11 : i64} {
  func.func @_soft_dot_kernel(%arg0: i32, %arg1: memref<8x32xf32, #tpu.memory_space<vmem>>, %arg2: memref<8x8x32xf32, #tpu.memory_space<vmem>>, %arg3: memref<32x32xf32, #tpu.memory_space<vmem>>, %arg4: memref<64x32xf32, #tpu.memory_space<vmem>>, %arg5: memref<8x32xf32, #tpu.memory_space<vmem>>, %arg6: memref<8x8xf32, #tpu.memory_space<vmem>>) attributes {dimension_semantics = [#tpu.dimension_semantics<parallel>], iteration_bounds = array<i64: 1>, scalar_prefetch = 0 : i64, scratch_operands = 0 : i64, tpu.core_type = #tpu.core_type<tc>, window_params = [{transform_indices = @transform_0, window_bounds = array<i64: 8, 32>}, {transform_indices = @transform_1, window_bounds = array<i64: 8, 8, 32>}, {pipeline_mode = #tpu.pipeline_mode<synchronous>, transform_indices = @transform_2, window_bounds = array<i64: 32, 32>}, {pipeline_mode = #tpu.pipeline_mode<synchronous>, transform_indices = @transform_3, window_bounds = array<i64: 64, 32>}, {transform_indices = @transform_4, window_bounds = array<i64: 8, 32>}, {transform_indices = @transform_5, window_bounds = array<i64: 8, 8>}]} {
    %c0 = arith.constant 0 : index
    %c0_0 = arith.constant 0 : index
    %0 = vector.load %arg1[%c0, %c0_0] : memref<8x32xf32, #tpu.memory_space<vmem>>, vector<8x32xf32>
    %c0_1 = arith.constant 0 : index
    %c0_2 = arith.constant 0 : index
    %c0_3 = arith.constant 0 : index
    %1 = vector.load %arg2[%c0_1, %c0_2, %c0_3] : memref<8x8x32xf32, #tpu.memory_space<vmem>>, vector<8x8x32xf32>
    %c0_4 = arith.constant 0 : index
    %c0_5 = arith.constant 0 : index
    %2 = vector.load %arg3[%c0_4, %c0_5] : memref<32x32xf32, #tpu.memory_space<vmem>>, vector<32x32xf32>
    %3 = vector.shape_cast %0 : vector<8x32xf32> to vector<8x32x1xf32>
    %4 = vector.shape_cast %2 : vector<32x32xf32> to vector<1x32x32xf32>
    %5 = vector.broadcast %3 : vector<8x32x1xf32> to vector<8x32x32xf32>
    %6 = vector.broadcast %4 : vector<1x32x32xf32> to vector<8x32x32xf32>
    %7 = arith.mulf %5, %6 : vector<8x32x32xf32>
    %cst = arith.constant dense<0.000000e+00> : vector<8x32xf32>
    %8 = vector.multi_reduction <add>, %7, %cst [1] : vector<8x32x32xf32> to vector<8x32xf32>
    %9 = vector.shape_cast %8 : vector<8x32xf32> to vector<8x1x32xf32>
    %10 = vector.broadcast %9 : vector<8x1x32xf32> to vector<8x8x32xf32>
    %11 = arith.mulf %1, %10 : vector<8x8x32xf32>
    %cst_6 = arith.constant dense<0.000000e+00> : vector<8x8xf32>
    %12 = vector.multi_reduction <add>, %11, %cst_6 [2] : vector<8x8x32xf32> to vector<8x8xf32>
    %cst_7 = arith.constant dense<0xFF800000> : vector<8xf32>
    %13 = vector.multi_reduction <maximumf>, %12, %cst_7 [1] : vector<8x8xf32> to vector<8xf32>
    %14 = vector.shape_cast %13 : vector<8xf32> to vector<8x1xf32>
    %15 = vector.broadcast %14 : vector<8x1xf32> to vector<8x8xf32>
    %16 = arith.subf %12, %15 : vector<8x8xf32>
    %17 = math.exp %16 : vector<8x8xf32>
    %cst_8 = arith.constant dense<0.000000e+00> : vector<8xf32>
    %18 = vector.multi_reduction <add>, %17, %cst_8 [1] : vector<8x8xf32> to vector<8xf32>
    %19 = vector.shape_cast %18 : vector<8xf32> to vector<8x1xf32>
    %20 = vector.broadcast %19 : vector<8x1xf32> to vector<8x8xf32>
    %21 = arith.divf %17, %20 : vector<8x8xf32>
    %c0_9 = arith.constant 0 : index
    %c0_10 = arith.constant 0 : index
    %22 = vector.load %arg6[%c0_9, %c0_10] : memref<8x8xf32, #tpu.memory_space<vmem>>, vector<8x8xf32>
    tpu.vector_store %arg6[%c0_9, %c0_10], %21 {strides = array<i32>} : memref<8x8xf32, #tpu.memory_space<vmem>>, vector<8x8xf32>,
    %23 = vector.shape_cast %21 : vector<8x8xf32> to vector<8x8x1xf32>
    %24 = vector.broadcast %23 : vector<8x8x1xf32> to vector<8x8x32xf32>
    %25 = arith.mulf %24, %1 : vector<8x8x32xf32>
    %cst_11 = arith.constant dense<0.000000e+00> : vector<8x32xf32>
    %26 = vector.multi_reduction <add>, %25, %cst_11 [1] : vector<8x8x32xf32> to vector<8x32xf32>
    %c0_12 = arith.constant 0 : index
    %c0_13 = arith.constant 0 : index
    %27 = vector.load %arg4[%c0_12, %c0_13] : memref<64x32xf32, #tpu.memory_space<vmem>>, vector<32x32xf32>
    %c32 = arith.constant 32 : index
    %c0_14 = arith.constant 0 : index
    %28 = vector.load %arg4[%c32, %c0_14] : memref<64x32xf32, #tpu.memory_space<vmem>>, vector<32x32xf32>
    %29 = vector.shape_cast %26 : vector<8x32xf32> to vector<8x32x1xf32>
    %30 = vector.shape_cast %27 : vector<32x32xf32> to vector<1x32x32xf32>
    %31 = vector.broadcast %29 : vector<8x32x1xf32> to vector<8x32x32xf32>
    %32 = vector.broadcast %30 : vector<1x32x32xf32> to vector<8x32x32xf32>
    %33 = arith.mulf %31, %32 : vector<8x32x32xf32>
    %cst_15 = arith.constant dense<0.000000e+00> : vector<8x32xf32>
    %34 = vector.multi_reduction <add>, %33, %cst_15 [1] : vector<8x32x32xf32> to vector<8x32xf32>
    %35 = vector.shape_cast %0 : vector<8x32xf32> to vector<8x32x1xf32>
    %36 = vector.shape_cast %28 : vector<32x32xf32> to vector<1x32x32xf32>
    %37 = vector.broadcast %35 : vector<8x32x1xf32> to vector<8x32x32xf32>
    %38 = vector.broadcast %36 : vector<1x32x32xf32> to vector<8x32x32xf32>
    %39 = arith.mulf %37, %38 : vector<8x32x32xf32>
    %cst_16 = arith.constant dense<0.000000e+00> : vector<8x32xf32>
    %40 = vector.multi_reduction <add>, %39, %cst_16 [1] : vector<8x32x32xf32> to vector<8x32xf32>
    %41 = arith.addf %34, %40 : vector<8x32xf32>
    %42 = math.tanh %41 : vector<8x32xf32>
    %c0_17 = arith.constant 0 : index
    %c0_18 = arith.constant 0 : index
    %43 = vector.load %arg5[%c0_17, %c0_18] : memref<8x32xf32, #tpu.memory_space<vmem>>, vector<8x32xf32>
    tpu.vector_store %arg5[%c0_17, %c0_18], %42 {strides = array<i32>} : memref<8x32xf32, #tpu.memory_space<vmem>>, vector<8x32xf32>,
    return
  }
  func.func @transform_0(%arg0: i32) -> (i32, i32) {
    %c0_i32 = arith.constant 0 : i32
    %c0_i32_0 = arith.constant 0 : i32
    return %arg0, %c0_i32 : i32, i32
  }
  func.func @transform_1(%arg0: i32) -> (i32, i32, i32) {
    %c0_i32 = arith.constant 0 : i32
    %c0_i32_0 = arith.constant 0 : i32
    %c0_i32_1 = arith.constant 0 : i32
    return %arg0, %c0_i32, %c0_i32_0 : i32, i32, i32
  }
  func.func @transform_2(%arg0: i32) -> (i32, i32) {
    %c0_i32 = arith.constant 0 : i32
    %c0_i32_0 = arith.constant 0 : i32
    %c0_i32_1 = arith.constant 0 : i32
    return %c0_i32, %c0_i32_0 : i32, i32
  }
  func.func @transform_3(%arg0: i32) -> (i32, i32) {
    %c0_i32 = arith.constant 0 : i32
    %c0_i32_0 = arith.constant 0 : i32
    %c0_i32_1 = arith.constant 0 : i32
    return %c0_i32, %c0_i32_0 : i32, i32
  }
  func.func @transform_4(%arg0: i32) -> (i32, i32) {
    %c0_i32 = arith.constant 0 : i32
    %c0_i32_0 = arith.constant 0 : i32
    return %arg0, %c0_i32 : i32, i32
  }
  func.func @transform_5(%arg0: i32) -> (i32, i32) {
    %c0_i32 = arith.constant 0 : i32
    %c0_i32_0 = arith.constant 0 : i32
    return %arg0, %c0_i32 : i32, i32
  }
}

</mosaic_0001>

<bundles_post_ra>
// kernel: soft_dot_attention.1
= control target key start
LH: loop header
LB: loop body
LE: loop exit
PB: predicated region body
PF: predicated region fallthrough
CT: control target
= control target key end

     0   :  { %v32_v0 = vlaneseq  ;;  %vm216_vm0 = vcmask 261120   ;;  %vm395_vm1 = vcmask 1041409   ;;  %vm397_vm2 = vcmask 1042434   ;;  %s1842_s0 = inlined_call_operand.vmem [shape: f32[8,32], index: 0, kind: input, shape index: {}]   ;;  %s1843_s3 = inlined_call_operand.vmem [shape: f32[64,32], index: 3, kind: input, shape index: {}]   ;;  %s1844_s2 = inlined_call_operand.vmem [shape: f32[32,32], index: 2, kind: input, shape index: {}]   ;;  %s1845_s1 = inlined_call_operand.vmem [shape: f32[8,8,32], index: 1, kind: input, shape index: {}]   ;;  %s1846_s5 = inlined_call_operand.vmem [shape: f32[8,8], index: 5, kind: output, shape index: {1}]   ;;  %s1847_s4 = inlined_call_operand.vmem [shape: f32[8,32], index: 4, kind: output, shape index: {0}]  }
   0x1   :  { %v19_v3 = vld [vmem:[%s1842_s0] sm:$0xff]  ;;  %v1317_v24 = vld [vmem:[%s1843_s3 + $0x28] sm:$0xff]  ;;  %v1338_v41 = vld [vmem:[%s1843_s3 + $0x30] sm:$0xff]  ;;  %vm399_vm3 = vcmask 1043459   ;;  %vm401_vm4 = vcmask 1044484   ;;  %vm403_vm5 = vcmask 1045509  }
   0x2   :  { %v33_v1 = vshrl.u32 %v32_v0, 7  ;;  %v362_v2 = vand.u32 127, %v32_v0  ;;  %v1312_v21 = vld [vmem:[%s1843_s3 + $0x20] sm:$0xff]  ;;  %v1347_v49 = vld [vmem:[%s1844_s2 + $0x8] sm:$0xff]  ;;  %v1359_v53 = vld [vmem:[%s1844_s2 + $0x10] sm:$0xff]  ;;  %vm405_vm6 = vcmask 1046534  }
   0x3   :  { %v1354_v52 = vld [vmem:[%s1844_s2] sm:$0xff]  ;;  %vm407_vm7 = vcmask 1047559   ;;  %vm410_vm8 = vcmask 64512  }
   0x4   :  { %v1283_v4 = vsub.s32 1, %v33_v1  ;;  %v1285_v5 = vsub.s32 %v362_v2, %v33_v1  ;;  %v1287_v6 = vsub.s32 0, %v33_v1  ;;  %v1291_v9 = vsub.s32 2, %v33_v1 }
   0x5   :  { %v1294_v11 = vsub.s32 3, %v33_v1  ;;  %v1297_v13 = vsub.s32 4, %v33_v1  ;;  %v1300_v15 = vsub.s32 5, %v33_v1  ;;  %v1303_v17 = vsub.s32 6, %v33_v1 }
   0x6   :  { %v54_v7 = vrot.slane %v19_v3, %v1283_v4  ;;  %v35_v8 = vrot.slane %v19_v3, %v1287_v6  ;;  %v73_v10 = vrot.slane %v19_v3, %v1291_v9  ;;  %v1306_v19 = vsub.s32 7, %v33_v1 }
   0x7   :  { %v92_v12 = vrot.slane %v19_v3, %v1294_v11  ;;  %v111_v14 = vrot.slane %v19_v3, %v1297_v13  ;;  %v130_v16 = vrot.slane %v19_v3, %v1300_v15  ;;  %v149_v18 = vrot.slane %v19_v3, %v1303_v17 }
   0x8   :  { %56 = vbcast.lane.b32.xlu1 %v54_v7, 256  ;;  %37 = vbcast.lane.b32.xlu0 %v35_v8, 256  ;;  %v168_v20 = vrot.slane %v19_v3, %v1306_v19 }
   0xc   :  { %60 = vbcast.lane.b32.xlu1 %v54_v7, 264  ;;  %41 = vbcast.lane.b32.xlu0 %v35_v8, 264 }
  0x10   :  { %79 = vbcast.lane.b32.xlu1 %v73_v10, 264  ;;  %75 = vbcast.lane.b32.xlu0 %v73_v10, 256 }
  0x14   :  { %64 = vbcast.lane.b32.xlu1 %v54_v7, 272  ;;  %45 = vbcast.lane.b32.xlu0 %v35_v8, 272 }
  0x18   :  { %98 = vbcast.lane.b32.xlu1 %v92_v12, 264  ;;  %94 = vbcast.lane.b32.xlu0 %v92_v12, 256 }
  0x1c   :  { %113 = vbcast.lane.b32.xlu1 %v111_v14, 256  ;;  %83 = vbcast.lane.b32.xlu0 %v73_v10, 272 }
  0x20   :  { %49 = vbcast.lane.b32.xlu1 %v35_v8, 280  ;;  %117 = vbcast.lane.b32.xlu0 %v111_v14, 264 }
  0x24   :  { %102 = vbcast.lane.b32.xlu1 %v92_v12, 272  ;;  %68 = vbcast.lane.b32.xlu0 %v54_v7, 280 }
  0x28   :  { %136 = vbcast.lane.b32.xlu1 %v130_v16, 264  ;;  %132 = vbcast.lane.b32.xlu0 %v130_v16, 256 }
  0x2c   :  { %121 = vbcast.lane.b32.xlu1 %v111_v14, 272  ;;  %87 = vbcast.lane.b32.xlu0 %v73_v10, 280 }
  0x30   :  { %155 = vbcast.lane.b32.xlu1 %v149_v18, 264  ;;  %151 = vbcast.lane.b32.xlu0 %v149_v18, 256 }
  0x34   :  { %140 = vbcast.lane.b32.xlu1 %v130_v16, 272  ;;  %106 = vbcast.lane.b32.xlu0 %v92_v12, 280 }
  0x38   :  { %174 = vbcast.lane.b32.xlu1 %v168_v20, 264  ;;  %170 = vbcast.lane.b32.xlu0 %v168_v20, 256 }
  0x3c   :  { %159 = vbcast.lane.b32.xlu1 %v149_v18, 272  ;;  %125 = vbcast.lane.b32.xlu0 %v111_v14, 280  ;;  %v1386_v14 = vld [vmem:[%s1844_s2 + $0x18] sm:$0xff] }
  0x40   :  { %178 = vbcast.lane.b32.xlu1 %v168_v20, 272  ;;  %144 = vbcast.lane.b32.xlu0 %v130_v16, 280  ;;  %v1391_v16 = vld [vmem:[%s1843_s3 + $0x38] sm:$0xff] }
  0x44   :  { %182 = vbcast.lane.b32.xlu1 %v168_v20, 280  ;;  %163 = vbcast.lane.b32.xlu0 %v149_v18, 280 }
  0x7a   :  { %v57_v22 = vpop.permute.xlu1 %56  ;;  %v38_v23 = vpop.permute.xlu0 %37 }
  0x7b   :  { %v1024_v25 = vmul.f32 %v1312_v21, %v57_v22  ;;  %v1020_v26 = vmul.f32 %v1312_v21, %v38_v23  ;;  %v184_v61 = vmul.f32 %v38_v23, %v1354_v52  ;;  %v188_v10 = vmul.f32 %v57_v22, %v1354_v52 }
  0x7d   :  { %v1065_v31 = vsel %vm216_vm0, %v1024_v25, 0.0  ;;  %v1052_v32 = vsel %vm216_vm0, %v1020_v26, 0.0  ;;  %v217_v18 = vsel %vm216_vm0, %v184_v61, 0.0 }
  0x7e   :  { %v61_v27 = vpop.permute.xlu1 %60  ;;  %v42_v28 = vpop.permute.xlu0 %41 }
  0x7f   :  { %v1025_v29 = vmul.f32 %v1317_v24, %v61_v27  ;;  %v1021_v30 = vmul.f32 %v1317_v24, %v42_v28  ;;  %v185_v58 = vmul.f32 %v42_v28, %v1347_v49  ;;  %v189_v12 = vmul.f32 %v61_v27, %v1347_v49 }
  0x81   :  { %v1066_v33 = vsel %vm216_vm0, %v1025_v29, 0.0  ;;  %v1053_v34 = vsel %vm216_vm0, %v1021_v30, 0.0  ;;  %v218_v7 = vsel %vm216_vm0, %v185_v58, 0.0 }
  0x82   :  { %v1067_v35 = vadd.f32 %v1066_v33, %v1065_v31  ;;  %v1054_v36 = vadd.f32 %v1053_v34, %v1052_v32  ;;  %v1327_v37 = vpop.permute.xlu1 %79  ;;  %v1329_v38 = vpop.permute.xlu0 %75  ;;  %v219_v25 = vadd.f32 %v218_v7, %v217_v18  ;;  %v230_v33 = vsel %vm216_vm0, %v188_v10, 0.0 }
  0x83   :  { %v1029_v39 = vmul.f32 %v1317_v24, %v1327_v37  ;;  %v1028_v40 = vmul.f32 %v1312_v21, %v1329_v38  ;;  %v231_v34 = vsel %vm216_vm0, %v189_v12, 0.0  ;;  %v192_v7 = vmul.f32 %v1329_v38, %v1354_v52 }
  0x85   :  { %v1079_v42 = vsel %vm216_vm0, %v1029_v39, 0.0  ;;  %v1078_v43 = vsel %vm216_vm0, %v1028_v40, 0.0 }
  0x86   :  { %v1080_v44 = vadd.f32 %v1079_v42, %v1078_v43  ;;  %v65_v45 = vpop.permute.xlu1 %64  ;;  %v46_v46 = vpop.permute.xlu0 %45 }
  0x87   :  { %v1026_v47 = vmul.f32 %v1338_v41, %v65_v45  ;;  %v1022_v48 = vmul.f32 %v1338_v41, %v46_v46  ;;  %v186_v62 = vmul.f32 %v46_v46, %v1359_v53  ;;  %v190_v26 = vmul.f32 %v65_v45, %v1359_v53 }
  0x89   :  { %v1068_v50 = vsel %vm216_vm0, %v1026_v47, 0.0  ;;  %v1055_v51 = vsel %vm216_vm0, %v1022_v48, 0.0  ;;  %v220_v20 = vsel %vm216_vm0, %v186_v62, 0.0  ;;  %v233_v43 = vsel %vm216_vm0, %v190_v26, 0.0 }
  0x8a   :  { %v1069_v54 = vadd.f32 %v1068_v50, %v1067_v35  ;;  %v1056_v55 = vadd.f32 %v1055_v51, %v1054_v36  ;;  %v1361_v56 = vpop.permute.xlu1 %98  ;;  %v1363_v57 = vpop.permute.xlu0 %94  ;;  %v221_v35 = vadd.f32 %v220_v20, %v219_v25  ;;  %v232_v50 = vadd.f32 %v231_v34, %v230_v33 }
  0x8b   :  { %v1033_v59 = vmul.f32 %v1317_v24, %v1361_v56  ;;  %v1032_v60 = vmul.f32 %v1312_v21, %v1363_v57  ;;  %v196_v34 = vmul.f32 %v1363_v57, %v1354_v52 }
  0x8c   :  { %v234_v62 = vadd.f32 %v233_v43, %v232_v50 }
  0x8d   :  { %v1092_v63 = vsel %vm216_vm0, %v1033_v59, 0.0  ;;  %v1091_v0 = vsel %vm216_vm0, %v1032_v60, 0.0  ;;  %v193_v60 = vmul.f32 %v1327_v37, %v1347_v49 }
  0x8e   :  { %v1093_v1 = vadd.f32 %v1092_v63, %v1091_v0  ;;  %v1374_v2 = vpop.permute.xlu1 %113  ;;  %v1376_v3 = vpop.permute.xlu0 %83 }
  0x8f   :  { %v1030_v8 = vmul.f32 %v1338_v41, %v1376_v3  ;;  %v1036_v23 = vmul.f32 %v1312_v21, %v1374_v2  ;;  %v244_v26 = vsel %vm216_vm0, %v193_v60, 0.0 }
  0x91   :  { %v1081_v22 = vsel %vm216_vm0, %v1030_v8, 0.0  ;;  %v1104_v36 = vsel %vm216_vm0, %v1036_v23, 0.0 }
  0x92   :  { %v1399_v27 = vadd.f32 %v1081_v22, %v1080_v44  ;;  %v50_v28 = vpop.permute.xlu1 %49  ;;  %v118_v29 = vpop.permute.xlu0 %117 }
  0x93   :  { %v187_v30 = vmul.f32 %v50_v28, %v1386_v14  ;;  %v1023_v31 = vmul.f32 %v1391_v16, %v50_v28  ;;  %v1037_v32 = vmul.f32 %v1317_v24, %v118_v29 }
  0x95   :  { %v222_v39 = vsel %vm216_vm0, %v187_v30, 0.0  ;;  %v1057_v40 = vsel %vm216_vm0, %v1023_v31, 0.0  ;;  %v1105_v42 = vsel %vm216_vm0, %v1037_v32, 0.0  ;;  %v243_v30 = vsel %vm216_vm0, %v192_v7, 0.0 }
  0x96   :  { %v223_v44 = vadd.f32 %v222_v39, %v221_v35  ;;  %v1411_v45 = vadd.f32 %v1057_v40, %v1056_v55  ;;  %v1106_v46 = vadd.f32 %v1105_v42, %v1104_v36  ;;  %v103_v47 = vpop.permute.xlu1 %102  ;;  %v69_v48 = vpop.permute.xlu0 %68  ;;  %v194_v36 = vmul.f32 %v1376_v3, %v1359_v53 }
  0x97   :  { %v1034_v51 = vmul.f32 %v1338_v41, %v103_v47  ;;  %v191_v58 = vmul.f32 %v69_v48, %v1386_v14  ;;  %v1027_v59 = vmul.f32 %v1391_v16, %v69_v48  ;;  %v201_v39 = vmul.f32 %v118_v29, %v1347_v49 }
  0x98   :  { %v224_v61 = vrot.slane %v223_v44, 4  ;;  %v245_v42 = vadd.f32 %v244_v26, %v243_v30  ;;  %v256_v3 = vsel %vm216_vm0, %v196_v34, 0.0  ;;  %v200_v29 = vmul.f32 %v1374_v2, %v1354_v52 }
  0x99   :  { %v1094_v63 = vsel %vm216_vm0, %v1034_v51, 0.0  ;;  %v235_v55 = vsel %vm216_vm0, %v191_v58, 0.0  ;;  %v1070_v0 = vsel %vm216_vm0, %v1027_v59, 0.0  ;;  %v246_v60 = vsel %vm216_vm0, %v194_v36, 0.0 }
  0x9a   :  { %v225_v8 = vadd.f32 %v224_v61, %v223_v44  ;;  %v1423_v10 = vadd.f32 %v1094_v63, %v1093_v1  ;;  %v137_v12 = vpop.permute.xlu1 %136  ;;  %v133_v18 = vpop.permute.xlu0 %132  ;;  %v236_v20 = vadd.f32 %v235_v55, %v234_v62  ;;  %v1425_v23 = vadd.f32 %v1070_v0, %v1069_v54 }
  0x9b   :  { %v1041_v37 = vmul.f32 %v1317_v24, %v137_v12  ;;  %v1040_v22 = vmul.f32 %v1312_v21, %v133_v18  ;;  %v197_v54 = vmul.f32 %v1361_v56, %v1347_v49  ;;  %v270_v61 = vsel %vm216_vm0, %v201_v39, 0.0 }
  0x9c   :  { %v226_v25 = vrot.slane %v225_v8, 2  ;;  %v237_v38 = vrot.slane %v236_v20, 4  ;;  %v198_v55 = vmul.f32 %v103_v47, %v1359_v53  ;;  %v205_v0 = vmul.f32 %v137_v12, %v1347_v49 }
  0x9d   :  { %v1118_v28 = vsel %vm216_vm0, %v1041_v37, 0.0  ;;  %v1117_v1 = vsel %vm216_vm0, %v1040_v22, 0.0  ;;  %v257_v58 = vsel %vm216_vm0, %v197_v54, 0.0  ;;  %v1468_v22 = vld [vmem:[%s1845_s1] sm:$0xff]  ;;  %v269_v12 = vsel %vm216_vm0, %v200_v29, 0.0 }
  0x9e   :  { %v122_v31 = vpop.permute.xlu1 %121  ;;  %v88_v32 = vpop.permute.xlu0 %87  ;;  %v227_v33 = vadd.f32 %v226_v25, %v225_v8  ;;  %v1119_v35 = vadd.f32 %v1118_v28, %v1117_v1  ;;  %v238_v44 = vadd.f32 %v237_v38, %v236_v20  ;;  %v204_v26 = vmul.f32 %v133_v18, %v1354_v52 }
  0x9f   :  { %v1038_v40 = vmul.f32 %v1338_v41, %v122_v31  ;;  %v1031_v43 = vmul.f32 %v1391_v16, %v88_v32  ;;  %v195_v50 = vmul.f32 %v88_v32, %v1386_v14  ;;  %v202_v28 = vmul.f32 %v122_v31, %v1359_v53 }
  0xa0   :  { %v228_v57 = vrot.slane %v227_v33, 1  ;;  %v239_v25 = vrot.slane %v238_v44, 2  ;;  %v258_v30 = vadd.f32 %v257_v58, %v256_v3  ;;  %v271_v38 = vadd.f32 %v270_v61, %v269_v12 }
  0xa1   :  { %v1107_v48 = vsel %vm216_vm0, %v1038_v40, 0.0  ;;  %v1083_v62 = vsel %vm216_vm0, %v1031_v43, 0.0  ;;  %v259_v39 = vsel %vm216_vm0, %v198_v55, 0.0  ;;  %v283_v40 = vsel %vm216_vm0, %v205_v0, 0.0 }
  0xa2   :  { %v156_v56 = vpop.permute.xlu1 %155  ;;  %v1444_v51 = vpop.permute.xlu0 %151  ;;  %v1450_v59 = vadd.f32 %v1107_v48, %v1106_v46  ;;  %v1459_v7 = vadd.f32 %v1083_v62, %v1399_v27  ;;  %v248_v46 = vsel %vm216_vm0, %v195_v50, 0.0  ;;  %v229_v47 = vadd.f32 %v228_v57, %v227_v33 }
  0xa3   :  { %v1045_v63 = vmul.f32 %v1317_v24, %v156_v56  ;;  %v1044_v2 = vmul.f32 %v1312_v21, %v1444_v51  ;;  %v247_v27 = vadd.f32 %v246_v60, %v245_v42  ;;  %v240_v43 = vadd.f32 %v239_v25, %v238_v44 }
  0xa4   :  { %v321_v33 = vmul.f32 %v229_v47, %v1468_v22  ;;  %v282_v48 = vsel %vm216_vm0, %v204_v26, 0.0  ;;  %v272_v50 = vsel %vm216_vm0, %v202_v28, 0.0  ;;  %v209_v3 = vmul.f32 %v156_v56, %v1347_v49 }
  0xa5   :  { %v1131_v8 = vsel %vm216_vm0, %v1045_v63, 0.0  ;;  %v1130_v1 = vsel %vm216_vm0, %v1044_v2, 0.0  ;;  %v249_v54 = vadd.f32 %v248_v46, %v247_v27  ;;  %v260_v62 = vadd.f32 %v259_v39, %v258_v30 }
  0xa6   :  { %v141_v20 = vpop.permute.xlu1 %140  ;;  %v107_v37 = vpop.permute.xlu0 %106  ;;  %v1132_v34 = vadd.f32 %v1131_v8, %v1130_v1  ;;  %v329_v60 = vsel %vm216_vm0, %v321_v33, 0.0  ;;  %v241_v56 = vrot.slane %v240_v43, 1 }
  0xa7   :  { %v1042_v32 = vmul.f32 %v1338_v41, %v141_v20  ;;  %v1035_v36 = vmul.f32 %v1391_v16, %v107_v37  ;;  %v199_v58 = vmul.f32 %v107_v37, %v1386_v14  ;;  %v250_v63 = vrot.slane %v249_v54, 4  ;;  %330 = vadd.xlane.f32.xlu0 %v329_v60 }
  0xa8   :  { %v206_v44 = vmul.f32 %v141_v20, %v1359_v53  ;;  %v273_v37 = vadd.f32 %v272_v50, %v271_v38  ;;  %v296_v20 = vsel %vm216_vm0, %v209_v3, 0.0  ;;  %v242_v27 = vadd.f32 %v241_v56, %v240_v43 }
  0xa9   :  { %v1120_v18 = vsel %vm216_vm0, %v1042_v32, 0.0  ;;  %v1096_v29 = vsel %vm216_vm0, %v1035_v36, 0.0  ;;  %v261_v47 = vsel %vm216_vm0, %v199_v58, 0.0  ;;  %v251_v26 = vadd.f32 %v250_v63, %v249_v54 }
  0xaa   :  { %v175_v42 = vpop.permute.xlu1 %174  ;;  %v171_v31 = vpop.permute.xlu0 %170  ;;  %v1482_v57 = vadd.f32 %v1120_v18, %v1119_v35  ;;  %v1491_v55 = vadd.f32 %v1096_v29, %v1423_v10  ;;  %v284_v35 = vadd.f32 %v283_v40, %v282_v48  ;;  %v1501_v10 = vld [vmem:[%s1845_s1 + $0x8] sm:$0xff]  ;;  %v285_v28 = vsel %vm216_vm0, %v206_v44, 0.0 }
  0xab   :  { %v1049_v61 = vmul.f32 %v1317_v24, %v175_v42  ;;  %v1048_v2 = vmul.f32 %v1312_v21, %v171_v31  ;;  %v213_v24 = vmul.f32 %v175_v42, %v1347_v49  ;;  %v212_v25 = vmul.f32 %v171_v31, %v1354_v52 }
  0xac   :  { %v208_v21 = vmul.f32 %v1444_v51, %v1354_v52  ;;  %v262_v38 = vadd.f32 %v261_v47, %v260_v62  ;;  %v322_v1 = vmul.f32 %v242_v27, %v1501_v10  ;;  %v286_v63 = vadd.f32 %v285_v28, %v284_v35 }
  0xad   :  { %v1144_v0 = vsel %vm216_vm0, %v1049_v61, 0.0  ;;  %v1143_v12 = vsel %vm216_vm0, %v1048_v2, 0.0  ;;  %v309_v52 = vsel %vm216_vm0, %v213_v24, 0.0  ;;  %v308_v51 = vsel %vm216_vm0, %v212_v25, 0.0 }
  0xae   :  { %v160_v46 = vpop.permute.xlu1 %159  ;;  %v126_v8 = vpop.permute.xlu0 %125  ;;  %v1145_v30 = vadd.f32 %v1144_v0, %v1143_v12  ;;  %v332_v18 = vsel %vm216_vm0, %v322_v1, 0.0  ;;  %v295_v48 = vsel %vm216_vm0, %v208_v21, 0.0  ;;  %v263_v44 = vrot.slane %v262_v38, 4 }
  0xaf   :  { %v1046_v49 = vmul.f32 %v1338_v41, %v160_v46  ;;  %v203_v32 = vmul.f32 %v126_v8, %v1386_v14  ;;  %v1039_v36 = vmul.f32 %v1391_v16, %v126_v8  ;;  %333 = vadd.xlane.f32.xlu1 %v332_v18  ;;  %v210_v50 = vmul.f32 %v160_v46, %v1359_v53 }
  0xb0   :  { %v310_v0 = vadd.f32 %v309_v52, %v308_v51  ;;  %v252_v2 = vrot.slane %v251_v26, 2  ;;  %v297_v12 = vadd.f32 %v296_v20, %v295_v48 }
  0xb1   :  { %v1133_v54 = vsel %vm216_vm0, %v1046_v49, 0.0  ;;  %v274_v31 = vsel %vm216_vm0, %v203_v32, 0.0  ;;  %v1109_v43 = vsel %vm216_vm0, %v1039_v36, 0.0  ;;  %v298_v8 = vsel %vm216_vm0, %v210_v50, 0.0 }
  0xb2   :  { %v179_v33 = vpop.permute.xlu1 %178  ;;  %v145_v39 = vpop.permute.xlu0 %144  ;;  %v1517_v42 = vadd.f32 %v1133_v54, %v1132_v34  ;;  %v275_v58 = vadd.f32 %v274_v31, %v273_v37  ;;  %v1524_v3 = vadd.f32 %v1109_v43, %v1450_v59  ;;  %v253_v25 = vadd.f32 %v252_v2, %v251_v26 }
  0xb3   :  { %v214_v40 = vmul.f32 %v179_v33, %v1359_v53  ;;  %v1050_v60 = vmul.f32 %v1338_v41, %v179_v33  ;;  %v207_v34 = vmul.f32 %v145_v39, %v1386_v14  ;;  %v1043_v61 = vmul.f32 %v1391_v16, %v145_v39 }
  0xb4   :  { %v276_v16 = vrot.slane %v275_v58, 4  ;;  %v264_v49 = vadd.f32 %v263_v44, %v262_v38  ;;  %v254_v32 = vrot.slane %v253_v25, 1  ;;  %v299_v36 = vadd.f32 %v298_v8, %v297_v12  ;;  %v1564_v44 = vld [vmem:[%s1845_s1 + $0x20] sm:$0xff] }
  0xb5   :  { %v311_v29 = vsel %vm216_vm0, %v214_v40, 0.0  ;;  %v1146_v53 = vsel %vm216_vm0, %v1050_v60, 0.0  ;;  %v287_v56 = vsel %vm216_vm0, %v207_v34, 0.0  ;;  %v1122_v59 = vsel %vm216_vm0, %v1043_v61, 0.0 }
  0xb6   :  { %v1530_v62 = vpop.permute.xlu1 %182  ;;  %v1537_v41 = vpop.permute.xlu0 %163  ;;  %v312_v37 = vadd.f32 %v311_v29, %v310_v0  ;;  %v1540_v47 = vadd.f32 %v1146_v53, %v1145_v30  ;;  %v288_v35 = vadd.f32 %v287_v56, %v286_v63  ;;  %v1543_v24 = vadd.f32 %v1122_v59, %v1482_v57  ;;  %v1551_v30 = vld [vmem:[%s1845_s1 + $0x10] sm:$0xff]  ;;  %v1559_v63 = vld [vmem:[%s1845_s1 + $0x18] sm:$0xff] }
  0xb7   :  { %v215_v46 = vmul.f32 %v1530_v62, %v1386_v14  ;;  %v211_v28 = vmul.f32 %v1537_v41, %v1386_v14  ;;  %v277_v33 = vadd.f32 %v276_v16, %v275_v58  ;;  %v255_v39 = vadd.f32 %v254_v32, %v253_v25 }
  0xb8   :  { %v289_v1 = vrot.slane %v288_v35, 4  ;;  %v265_v38 = vrot.slane %v264_v49, 2 }
  0xb9   :  { %v313_v21 = vsel %vm216_vm0, %v215_v46, 0.0  ;;  %v300_v26 = vsel %vm216_vm0, %v211_v28, 0.0  ;;  %v323_v51 = vmul.f32 %v255_v39, %v1551_v30  ;;  %v278_v40 = vrot.slane %v277_v33, 2  ;;  %v1569_v46 = vld [vmem:[%s1845_s1 + $0x28] sm:$0xff] }
  0xba   :  { %v314_v27 = vadd.f32 %v313_v21, %v312_v37  ;;  %v290_v52 = vadd.f32 %v289_v1, %v288_v35  ;;  %v301_v20 = vadd.f32 %v300_v26, %v299_v36  ;;  %v266_v43 = vadd.f32 %v265_v38, %v264_v49  ;;  %v1576_v21 = vld [vmem:[%s1845_s1 + $0x38] sm:$0xff] }
  0xbb   :  { %v335_v18 = vsel %vm216_vm0, %v323_v51, 0.0  ;;  %v279_v48 = vadd.f32 %v278_v40, %v277_v33 }
  0xbc   :  { %v315_v57 = vrot.slane %v314_v27, 4  ;;  %v302_v14 = vrot.slane %v301_v20, 4  ;;  %336 = vadd.xlane.f32.xlu0 %v335_v18  ;;  %v291_v50 = vrot.slane %v290_v52, 2  ;;  %v267_v29 = vrot.slane %v266_v43, 1 }
  0xbd   :  { %v280_v60 = vrot.slane %v279_v48, 1 }
  0xbe   :  { %v316_v54 = vadd.f32 %v315_v57, %v314_v27  ;;  %v303_v31 = vadd.f32 %v302_v14, %v301_v20  ;;  %v292_v34 = vadd.f32 %v291_v50, %v290_v52  ;;  %v268_v2 = vadd.f32 %v267_v29, %v266_v43  ;;  %v1581_v27 = vld [vmem:[%s1845_s1 + $0x30] sm:$0xff] }
  0xbf   :  { %v281_v53 = vadd.f32 %v280_v60, %v279_v48 }
  0xc0   :  { %v317_v58 = vrot.slane %v316_v54, 2  ;;  %v304_v61 = vrot.slane %v303_v31, 2  ;;  %v293_v56 = vrot.slane %v292_v34, 1  ;;  %v324_v16 = vmul.f32 %v268_v2, %v1559_v63 }
  0xc1   :  { %v325_v37 = vmul.f32 %v281_v53, %v1564_v44 }
  0xc2   :  { %v318_v0 = vadd.f32 %v317_v58, %v316_v54  ;;  %v305_v59 = vadd.f32 %v304_v61, %v303_v31  ;;  %v294_v35 = vadd.f32 %v293_v56, %v292_v34  ;;  %v338_v28 = vsel %vm216_vm0, %v324_v16, 0.0 }
  0xc3   :  { %v341_v49 = vsel %vm216_vm0, %v325_v37, 0.0  ;;  %339 = vadd.xlane.f32.xlu0 %v338_v28  ;;  %v1249_v37 = vmov 0  }
  0xc4   :  { %v319_v8 = vrot.slane %v318_v0, 1  ;;  %v306_v25 = vrot.slane %v305_v59, 1  ;;  %v326_v1 = vmul.f32 %v294_v35, %v1569_v46  ;;  %342 = vadd.xlane.f32.xlu1 %v341_v49  ;;  %1198 = vset.pattern.permute.xlu0 %v1249_v37 }
  0xc5   :  { %1199 = vset.pattern.permute.xlu1 %v1249_v37 }
  0xc6   :  { %v320_v12 = vadd.f32 %v319_v8, %v318_v0  ;;  %v307_v32 = vadd.f32 %v306_v25, %v305_v59  ;;  %v344_v36 = vsel %vm216_vm0, %v326_v1, 0.0 }
  0xc7   :  { %345 = vadd.xlane.f32.xlu0 %v344_v36 }
  0xc8   :  { %v328_v33 = vmul.f32 %v320_v12, %v1576_v21  ;;  %v327_v57 = vmul.f32 %v307_v32, %v1581_v27 }
  0xca   :  { %v347_v26 = vsel %vm216_vm0, %v327_v57, 0.0  ;;  %v350_v39 = vsel %vm216_vm0, %v328_v33, 0.0 }
  0xcb   :  { %348 = vadd.xlane.f32.xlu1 %v347_v26  ;;  %351 = vadd.xlane.f32.xlu0 %v350_v39 }
 0x134   :  { %v331_v52 = vpop.xlane.xlu0 %330 }
 0x135   :  { %v366_v18 = vrot.slane %v331_v52, %v1285_v5 }
 0x13c   :  { %v334_v20 = vpop.xlane.xlu1 %333 }
 0x13d   :  { %v370_v54 = vrot.slane %v334_v20, %v1285_v5 }
 0x13f   :  { %v396_v48 = vsel %vm395_vm1, %v370_v54, %v366_v18 }
 0x149   :  { %v337_v51 = vpop.xlane.xlu0 %336 }
 0x14a   :  { %v374_v14 = vrot.slane %v337_v51, %v1285_v5 }
 0x14c   :  { %v398_v50 = vsel %vm397_vm2, %v374_v14, %v396_v48 }
 0x150   :  { %v340_v38 = vpop.xlane.xlu0 %339 }
 0x151   :  { %v343_v40 = vpop.xlane.xlu1 %342  ;;  %v378_v31 = vrot.slane %v340_v38, %v1285_v5 }
 0x152   :  { %v382_v43 = vrot.slane %v343_v40, %v1285_v5 }
 0x153   :  { %v400_v60 = vsel %vm399_vm3, %v378_v31, %v398_v50 }
 0x154   :  { %v346_v58 = vpop.xlane.xlu0 %345  ;;  %v402_v0 = vsel %vm401_vm4, %v382_v43, %v400_v60 }
 0x155   :  { %v386_v34 = vrot.slane %v346_v58, %v1285_v5 }
 0x157   :  { %v404_v2 = vsel %vm403_vm5, %v386_v34, %v402_v0 }
 0x158   :  { %v349_v29 = vpop.xlane.xlu1 %348  ;;  %v352_v53 = vpop.xlane.xlu0 %351 }
 0x159   :  { %v390_v61 = vrot.slane %v349_v29, %v1285_v5  ;;  %v394_v59 = vrot.slane %v352_v53, %v1285_v5 }
 0x15b   :  { %v406_v56 = vsel %vm405_vm6, %v390_v61, %v404_v2 }
 0x15c   :  { %v408_v8 = vsel %vm407_vm7, %v394_v59, %v406_v56 }
 0x15d   :  { %v411_v16 = vsel %vm410_vm8, %v408_v8, -inf }
 0x15e   :  { %412 = vmax.xlane.f32.xlu1 %v411_v16 }
 0x1eb   :  { %v413_v35 = vpop.xlane.xlu1 %412 }
 0x1ec   :  { %v418_v25 = vrot.slane %v413_v35, %v1287_v6  ;;  %v422_v12 = vrot.slane %v413_v35, %v1283_v4  ;;  %v426_v28 = vrot.slane %v413_v35, %v1291_v9  ;;  %v430_v32 = vrot.slane %v413_v35, %v1294_v11 }
 0x1ed   :  { %v434_v26 = vrot.slane %v413_v35, %v1297_v13  ;;  %v438_v14 = vrot.slane %v413_v35, %v1300_v15  ;;  %v442_v43 = vrot.slane %v413_v35, %v1303_v17 }
 0x1ee   :  { %v455_v49 = vsub.f32 %v331_v52, %v418_v25  ;;  %v456_v1 = vsub.f32 %v334_v20, %v422_v12  ;;  %v457_v36 = vsub.f32 %v337_v51, %v426_v28  ;;  %v458_v39 = vsub.f32 %v340_v38, %v430_v32 }
 0x1ef   :  { %v459_v18 = vsub.f32 %v343_v40, %v434_v26  ;;  %v460_v52 = vsub.f32 %v346_v58, %v438_v14  ;;  %v446_v38 = vrot.slane %v413_v35, %v1306_v19  ;;  %v461_v50 = vsub.f32 %v349_v29, %v442_v43 }
 0x1f0   :  { %v463_v33 = vmul.f32 1.442695, %v455_v49  ;;  %v465_v57 = vmul.f32 1.442695, %v456_v1  ;;  %v467_v54 = vmul.f32 1.442695, %v457_v36 }
 0x1f1   :  { %v469_v31 = vmul.f32 1.442695, %v458_v39  ;;  %v471_v20 = vmul.f32 1.442695, %v459_v18  ;;  %v473_v60 = vmul.f32 1.442695, %v460_v52  ;;  %v462_v40 = vsub.f32 %v352_v53, %v446_v38 }
 0x1f2   :  { %1200 = vpow2.f32 %v463_v33  ;;  %v475_v58 = vmul.f32 1.442695, %v461_v50 }
 0x1f3   :  { %1202 = vpow2.f32 %v465_v57  ;;  %v477_v0 = vmul.f32 1.442695, %v462_v40 }
 0x1f4   :  { %1204 = vpow2.f32 %v467_v54 }
 0x1f5   :  { %1206 = vpow2.f32 %v469_v31 }
 0x1f6   :  { %1208 = vpow2.f32 %v471_v20 }
 0x1f7   :  { %1210 = vpow2.f32 %v473_v60 }
 0x1f8   :  { %1212 = vpow2.f32 %v475_v58 }
 0x1f9   :  { %1214 = vpow2.f32 %v477_v0 }
 0x1fc   :  { %v1201_v48 = vpop.eup %1200 }
 0x1fd   :  { %v1614_v51 = vpop.eup %1202  ;;  %488 = vperm.xlu0 %1198, %v1201_v48  }
 0x1fe   :  { %491 = vperm.xlu1 %1199, %v1614_v51   ;;  %v1618_v34 = vpop.eup %1204 }
 0x1ff   :  { %v1621_v61 = vpop.eup %1206 }
 0x200   :  { %v1624_v2 = vpop.eup %1208 }
 0x201   :  { %v1627_v29 = vpop.eup %1210 }
 0x202   :  { %494 = vperm.xlu1 %1199, %v1618_v34   ;;  %v1630_v56 = vpop.eup %1212 }
 0x203   :  { %v1633_v53 = vpop.eup %1214 }
 0x206   :  { %497 = vperm.xlu1 %1199, %v1621_v61  }
 0x20a   :  { %500 = vperm.xlu1 %1199, %v1624_v2  }
 0x20e   :  { %503 = vperm.xlu1 %1199, %v1627_v29  }
 0x212   :  { %506 = vperm.xlu1 %1199, %v1630_v56  }
 0x216   :  { %509 = vperm.xlu1 %1199, %v1633_v53  }
 0x27c   :  { %v489_v35 = vpop.permute.xlu0 %488 }
 0x27d   :  { %v492_v59 = vpop.permute.xlu1 %491  ;;  %v514_v28 = vrot.slane %v489_v35, %v1285_v5 }
 0x27e   :  { %v518_v12 = vrot.slane %v492_v59, %v1285_v5 }
 0x280   :  { %v543_v33 = vsel %vm395_vm1, %v518_v12, %v514_v28 }
 0x281   :  { %v495_v8 = vpop.permute.xlu1 %494 }
 0x282   :  { %v522_v49 = vrot.slane %v495_v8, %v1285_v5 }
 0x284   :  { %v544_v26 = vsel %vm397_vm2, %v522_v49, %v543_v33 }
 0x285   :  { %v498_v16 = vpop.permute.xlu1 %497 }
 0x286   :  { %v526_v1 = vrot.slane %v498_v16, %v1285_v5 }
 0x288   :  { %v545_v54 = vsel %vm399_vm3, %v526_v1, %v544_v26 }
 0x289   :  { %v501_v37 = vpop.permute.xlu1 %500 }
 0x28a   :  { %v530_v32 = vrot.slane %v501_v37, %v1285_v5 }
 0x28c   :  { %v546_v14 = vsel %vm401_vm4, %v530_v32, %v545_v54 }
 0x28d   :  { %v504_v25 = vpop.permute.xlu1 %503 }
 0x28e   :  { %v534_v57 = vrot.slane %v504_v25, %v1285_v5 }
 0x290   :  { %v547_v31 = vsel %vm403_vm5, %v534_v57, %v546_v14 }
 0x291   :  { %v507_v36 = vpop.permute.xlu1 %506 }
 0x292   :  { %v538_v39 = vrot.slane %v507_v36, %v1285_v5 }
 0x294   :  { %v548_v52 = vsel %vm405_vm6, %v538_v39, %v547_v31 }
 0x295   :  { %v510_v18 = vpop.permute.xlu1 %509 }
 0x296   :  { %v542_v43 = vrot.slane %v510_v18, %v1285_v5 }
 0x298   :  { %v549_v20 = vsel %vm407_vm7, %v542_v43, %v548_v52 }
 0x299   :  { %v551_v38 = vsel %vm410_vm8, %v549_v20, 0.0 }
 0x29a   :  { %552 = vadd.xlane.f32.xlu1 %v551_v38 }
 0x327   :  { %v553_v50 = vpop.xlane.xlu1 %552 }
 0x328   :  { %v558_v60 = vrot.slane %v553_v50, %v1287_v6  ;;  %v562_v40 = vrot.slane %v553_v50, %v1283_v4  ;;  %v566_v58 = vrot.slane %v553_v50, %v1291_v9  ;;  %v570_v0 = vrot.slane %v553_v50, %v1294_v11 }
 0x329   :  { %v574_v8 = vrot.slane %v553_v50, %v1297_v13  ;;  %v578_v35 = vrot.slane %v553_v50, %v1300_v15  ;;  %v582_v9 = vrot.slane %v553_v50, %v1303_v17  ;;  %v586_v13 = vrot.slane %v553_v50, %v1306_v19 }
 0x32a   :  { %1216 = vrcp.f32 %v558_v60 }
 0x32b   :  { %1218 = vrcp.f32 %v562_v40 }
 0x32c   :  { %1220 = vrcp.f32 %v566_v58 }
 0x32d   :  { %1222 = vrcp.f32 %v570_v0 }
 0x32e   :  { %1224 = vrcp.f32 %v574_v8 }
 0x32f   :  { %1226 = vrcp.f32 %v578_v35 }
 0x330   :  { %1228 = vrcp.f32 %v582_v9 }
 0x331   :  { %1230 = vrcp.f32 %v586_v13 }
 0x334   :  { %v1217_v59 = vpop.eup %1216 }
 0x335   :  { %v596_v16 = vmul.f32 %v1217_v59, %v1201_v48  ;;  %v1219_v37 = vpop.eup %1218 }
 0x336   :  { %v598_v6 = vmul.f32 %v1219_v37, %v1614_v51  ;;  %v1221_v4 = vpop.eup %1220 }
 0x337   :  { %620 = vperm.xlu0 %1198, %v596_v16   ;;  %v600_v25 = vmul.f32 %v1221_v4, %v1618_v34  ;;  %v1223_v11 = vpop.eup %1222 }
 0x338   :  { %v602_v48 = vmul.f32 %v1223_v11, %v1621_v61  ;;  %v1225_v12 = vpop.eup %1224 }
 0x339   :  { %v604_v15 = vmul.f32 %v1225_v12, %v1624_v2  ;;  %v1227_v51 = vpop.eup %1226 }
 0x33a   :  { %v606_v28 = vmul.f32 %v1227_v51, %v1627_v29  ;;  %v1229_v49 = vpop.eup %1228 }
 0x33b   :  { %623 = vperm.xlu0 %1198, %v598_v6   ;;  %v608_v17 = vmul.f32 %v1229_v49, %v1630_v56  ;;  %v1231_v34 = vpop.eup %1230 }
 0x33c   :  { %v610_v1 = vmul.f32 %v1231_v34, %v1633_v53 }
 0x33f   :  { %626 = vperm.xlu0 %1198, %v600_v25  }
 0x343   :  { %629 = vperm.xlu0 %1198, %v602_v48  }
 0x347   :  { %632 = vperm.xlu0 %1198, %v604_v15  }
 0x34b   :  { %635 = vperm.xlu0 %1198, %v606_v28  }
 0x34f   :  { %638 = vperm.xlu0 %1198, %v608_v17  }
 0x353   :  { %641 = vperm.xlu0 %1198, %v610_v1  }
 0x3b6   :  { %v621_v19 = vpop.permute.xlu0 %620 }
 0x3b7   :  { %v692_v61 = vmul.f32 %v621_v19, %v1468_v22  ;;  %v646_v25 = vrot.slane %v621_v19, %v1285_v5 }
 0x3b9   :  { %v700_v32 = vsel %vm216_vm0, %v692_v61, 0.0 }
 0x3ba   :  { %v701_v36 = vrot.slane %v700_v32, 4  ;;  %v624_v2 = vpop.permute.xlu0 %623 }
 0x3bb   :  { %v693_v33 = vmul.f32 %v624_v2, %v1501_v10 }
 0x3bc   :  { %v702_v57 = vadd.f32 %v701_v36, %v700_v32 }
 0x3bd   :  { %v707_v29 = vsel %vm216_vm0, %v693_v33, 0.0 }
 0x3be   :  { %v703_v26 = vrot.slane %v702_v57, 2  ;;  %v708_v39 = vrot.slane %v707_v29, 4  ;;  %v627_v56 = vpop.permute.xlu0 %626 }
 0x3bf   :  { %v694_v54 = vmul.f32 %v627_v56, %v1551_v30  ;;  %v654_v11 = vrot.slane %v627_v56, %v1285_v5 }
 0x3c0   :  { %v704_v14 = vadd.f32 %v703_v26, %v702_v57  ;;  %v709_v53 = vadd.f32 %v708_v39, %v707_v29 }
 0x3c1   :  { %v714_v18 = vsel %vm216_vm0, %v694_v54, 0.0 }
 0x3c2   :  { %v705_v31 = vrot.slane %v704_v14, 1  ;;  %v710_v22 = vrot.slane %v709_v53, 2  ;;  %v715_v43 = vrot.slane %v714_v18, 4  ;;  %v630_v52 = vpop.permute.xlu0 %629 }
 0x3c3   :  { %v695_v20 = vmul.f32 %v630_v52, %v1559_v63  ;;  %v650_v63 = vrot.slane %v624_v2, %v1285_v5  ;;  %v658_v51 = vrot.slane %v630_v52, %v1285_v5 }
 0x3c4   :  { %v711_v38 = vadd.f32 %v710_v22, %v709_v53  ;;  %v716_v10 = vadd.f32 %v715_v43, %v714_v18  ;;  %v1674_v50 = vadd.f32 %v705_v31, %v704_v14 }
 0x3c5   :  { %v721_v60 = vsel %vm216_vm0, %v695_v20, 0.0  ;;  %v675_v15 = vsel %vm395_vm1, %v650_v63, %v646_v25 }
 0x3c6   :  { %v712_v40 = vrot.slane %v711_v38, 1  ;;  %v717_v58 = vrot.slane %v716_v10, 2  ;;  %v722_v0 = vrot.slane %v721_v60, 4  ;;  %769 = vbcast.lane.b32.xlu1 %v1674_v50, 264  ;;  %765 = vbcast.lane.b32.xlu0 %v1674_v50, 256  ;;  %v633_v30 = vpop.permute.xlu0 %632  ;;  %v676_v61 = vsel %vm397_vm2, %v654_v11, %v675_v15 }
 0x3c7   :  { %v696_v59 = vmul.f32 %v633_v30, %v1564_v44  ;;  %v662_v17 = vrot.slane %v633_v30, %v1285_v5  ;;  %v677_v26 = vsel %vm399_vm3, %v658_v51, %v676_v61  ;;  %v1719_v51 = vld [vmem:[%s1843_s3] sm:$0xff] }
 0x3c8   :  { %v718_v8 = vadd.f32 %v717_v58, %v716_v10  ;;  %v723_v16 = vadd.f32 %v722_v0, %v721_v60  ;;  %v713_v37 = vadd.f32 %v712_v40, %v711_v38 }
 0x3c9   :  { %v728_v35 = vsel %vm216_vm0, %v696_v59, 0.0  ;;  %v678_v56 = vsel %vm401_vm4, %v662_v17, %v677_v26  ;;  %v1072_v17 = vrot.slane %v1425_v23, 4 }
 0x3ca   :  { %v724_v6 = vrot.slane %v723_v16, 2  ;;  %v729_v4 = vrot.slane %v728_v35, 4  ;;  %773 = vbcast.lane.b32.xlu1 %v1674_v50, 272  ;;  %780 = vbcast.lane.b32.xlu0 %v713_v37, 256  ;;  %v636_v9 = vpop.permute.xlu0 %635  ;;  %v719_v13 = vrot.slane %v718_v8, 1 }
 0x3cb   :  { %v697_v44 = vmul.f32 %v636_v9, %v1569_v46  ;;  %v666_v32 = vrot.slane %v636_v9, %v1285_v5 }
 0x3cc   :  { %v725_v48 = vadd.f32 %v724_v6, %v723_v16  ;;  %v730_v12 = vadd.f32 %v729_v4, %v728_v35  ;;  %v720_v36 = vadd.f32 %v719_v13, %v718_v8 }
 0x3cd   :  { %v735_v28 = vsel %vm216_vm0, %v697_v44, 0.0  ;;  %v679_v14 = vsel %vm403_vm5, %v666_v32, %v678_v56  ;;  %v1713_v44 = vld [vmem:[%s1843_s3 + $0x8] sm:$0xff] }
 0x3ce   :  { %v726_v49 = vrot.slane %v725_v48, 1  ;;  %v731_v34 = vrot.slane %v730_v12, 2  ;;  %v736_v1 = vrot.slane %v735_v28, 4  ;;  %784 = vbcast.lane.b32.xlu0 %v713_v37, 264  ;;  %v639_v19 = vpop.permute.xlu0 %638 }
 0x3cf   :  { %v698_v46 = vmul.f32 %v639_v19, %v1581_v27  ;;  %v670_v57 = vrot.slane %v639_v19, %v1285_v5 }
 0x3d0   :  { %v732_v2 = vadd.f32 %v731_v34, %v730_v12  ;;  %v737_v33 = vadd.f32 %v736_v1, %v735_v28  ;;  %v727_v29 = vadd.f32 %v726_v49, %v725_v48  ;;  %v1059_v49 = vrot.slane %v1411_v45, 4  ;;  %v1727_v34 = vld [vmem:[%s1843_s3 + $0x10] sm:$0xff] }
 0x3d1   :  { %v742_v39 = vsel %vm216_vm0, %v698_v46, 0.0  ;;  %v680_v31 = vsel %vm405_vm6, %v670_v57, %v679_v14  ;;  %v1085_v46 = vrot.slane %v1459_v7, 4 }
 0x3d2   :  { %795 = vbcast.lane.b32.xlu0 %v720_v36, 256  ;;  %810 = vbcast.lane.b32.xlu1 %v727_v29, 256  ;;  %v642_v54 = vpop.permute.xlu0 %641  ;;  %v733_v27 = vrot.slane %v732_v2, 1  ;;  %v738_v18 = vrot.slane %v737_v33, 2  ;;  %v743_v22 = vrot.slane %v742_v39, 4  ;;  %v1060_v26 = vadd.f32 %v1059_v49, %v1411_v45 }
 0x3d3   :  { %v674_v53 = vrot.slane %v642_v54, %v1285_v5  ;;  %v699_v52 = vmul.f32 %v642_v54, %v1576_v21 }
 0x3d4   :  { %v739_v20 = vadd.f32 %v738_v18, %v737_v33  ;;  %v744_v38 = vadd.f32 %v743_v22, %v742_v39  ;;  %v734_v10 = vadd.f32 %v733_v27, %v732_v2  ;;  %v1098_v2 = vrot.slane %v1491_v55, 4 }
 0x3d5   :  { %v681_v43 = vsel %vm407_vm7, %v674_v53, %v680_v31  ;;  %v749_v5 = vsel %vm216_vm0, %v699_v52, 0.0  ;;  %v1073_v39 = vadd.f32 %v1072_v17, %v1425_v23  ;;  %v1086_v22 = vadd.f32 %v1085_v46, %v1459_v7 }
 0x3d6   :  { %683 = vst.msk [vmem:[%s1846_s5] sm:$0xff] %vm410_vm8, %v681_v43  ;;  %799 = vbcast.lane.b32.xlu0 %v720_v36, 264  ;;  %803 = vbcast.lane.b32.xlu1 %v720_v36, 272  ;;  %v740_v60 = vrot.slane %v739_v20, 1  ;;  %v745_v40 = vrot.slane %v744_v38, 2  ;;  %v750_v58 = vrot.slane %v749_v5, 4  ;;  %v1099_v52 = vadd.f32 %v1098_v2, %v1491_v55 }
 0x3d8   :  { %v746_v21 = vadd.f32 %v745_v40, %v744_v38  ;;  %v751_v0 = vadd.f32 %v750_v58, %v749_v5  ;;  %v741_v30 = vadd.f32 %v740_v60, %v739_v20  ;;  %v1061_v38 = vrot.slane %v1060_v26, 2 }
 0x3da   :  { %788 = vbcast.lane.b32.xlu0 %v713_v37, 272  ;;  %829 = vbcast.lane.b32.xlu1 %v734_v10, 264  ;;  %v747_v59 = vrot.slane %v746_v21, 1  ;;  %v752_v8 = vrot.slane %v751_v0, 2 }
 0x3dc   :  { %v753_v16 = vadd.f32 %v752_v8, %v751_v0  ;;  %v748_v63 = vadd.f32 %v747_v59, %v746_v21  ;;  %v1087_v0 = vrot.slane %v1086_v22, 2  ;;  %v1100_v8 = vrot.slane %v1099_v52, 2 }
 0x3de   :  { %814 = vbcast.lane.b32.xlu0 %v727_v29, 264  ;;  %792 = vbcast.lane.b32.xlu1 %v713_v37, 280  ;;  %v754_v35 = vrot.slane %v753_v16, 1  ;;  %v1101_v17 = vadd.f32 %v1100_v8, %v1099_v52 }
 0x3e0   :  { %v755_v6 = vadd.f32 %v754_v35, %v753_v16 }
 0x3e2   :  { %825 = vbcast.lane.b32.xlu0 %v734_v10, 256  ;;  %840 = vbcast.lane.b32.xlu1 %v741_v30, 256 }
 0x3e6   :  { %777 = vbcast.lane.b32.xlu0 %v1674_v50, 280  ;;  %807 = vbcast.lane.b32.xlu1 %v720_v36, 280  ;;  %v1737_v36 = vld [vmem:[%s1843_s3 + $0x18] sm:$0xff] }
 0x3ea   :  { %818 = vbcast.lane.b32.xlu0 %v727_v29, 272  ;;  %855 = vbcast.lane.b32.xlu1 %v748_v63, 256 }
 0x3ee   :  { %844 = vbcast.lane.b32.xlu0 %v741_v30, 264  ;;  %822 = vbcast.lane.b32.xlu1 %v727_v29, 280 }
 0x3f2   :  { %833 = vbcast.lane.b32.xlu0 %v734_v10, 272  ;;  %870 = vbcast.lane.b32.xlu1 %v755_v6, 256 }
 0x3f6   :  { %859 = vbcast.lane.b32.xlu0 %v748_v63, 264  ;;  %837 = vbcast.lane.b32.xlu1 %v734_v10, 280  ;;  %v1074_v10 = vrot.slane %v1073_v39, 2 }
 0x3f8   :  { %v1075_v35 = vadd.f32 %v1074_v10, %v1073_v39 }
 0x3fa   :  { %848 = vbcast.lane.b32.xlu0 %v741_v30, 272  ;;  %852 = vbcast.lane.b32.xlu1 %v741_v30, 280  ;;  %v1076_v39 = vrot.slane %v1075_v35, 1 }
 0x3fe   :  { %874 = vbcast.lane.b32.xlu0 %v755_v6, 264  ;;  %867 = vbcast.lane.b32.xlu1 %v748_v63, 280 }
 0x402   :  { %863 = vbcast.lane.b32.xlu0 %v748_v63, 272  ;;  %v1062_v63 = vadd.f32 %v1061_v38, %v1060_v26 }
 0x404   :  { %v1063_v26 = vrot.slane %v1062_v63, 1 }
 0x406   :  { %878 = vbcast.lane.b32.xlu0 %v755_v6, 272  ;;  %v1064_v10 = vadd.f32 %v1063_v26, %v1062_v63 }
 0x40a   :  { %882 = vbcast.lane.b32.xlu0 %v755_v6, 280 }
 0x438   :  { %v766_v50 = vpop.permute.xlu0 %765  ;;  %v770_v37 = vpop.permute.xlu1 %769 }
 0x439   :  { %v885_v53 = vmul.f32 %v770_v37, %v1713_v44  ;;  %v884_v27 = vmul.f32 %v766_v50, %v1719_v51 }
 0x43b   :  { %v917_v58 = vsel %vm216_vm0, %v885_v53, 0.0  ;;  %v916_v21 = vsel %vm216_vm0, %v884_v27, 0.0 }
 0x43c   :  { %v781_v4 = vpop.permute.xlu0 %780  ;;  %v774_v9 = vpop.permute.xlu1 %773  ;;  %v918_v6 = vadd.f32 %v917_v58, %v916_v21 }
 0x43d   :  { %v888_v28 = vmul.f32 %v781_v4, %v1719_v51  ;;  %v886_v45 = vmul.f32 %v774_v9, %v1727_v34 }
 0x43f   :  { %v929_v33 = vsel %vm216_vm0, %v888_v28, 0.0  ;;  %v919_v16 = vsel %vm216_vm0, %v886_v45, 0.0 }
 0x440   :  { %v785_v25 = vpop.permute.xlu0 %784 }
 0x441   :  { %v889_v15 = vmul.f32 %v785_v25, %v1713_v44 }
 0x443   :  { %v930_v61 = vsel %vm216_vm0, %v889_v15, 0.0  ;;  %v920_v15 = vadd.f32 %v919_v16, %v918_v6 }
 0x444   :  { %v1708_v11 = vpop.permute.xlu1 %810  ;;  %v796_v13 = vpop.permute.xlu0 %795  ;;  %v931_v56 = vadd.f32 %v930_v61, %v929_v33 }
 0x445   :  { %v892_v18 = vmul.f32 %v796_v13, %v1719_v51 }
 0x447   :  { %v942_v7 = vsel %vm216_vm0, %v892_v18, 0.0 }
 0x448   :  { %v804_v48 = vpop.permute.xlu1 %803  ;;  %v800_v12 = vpop.permute.xlu0 %799 }
 0x449   :  { %v893_v57 = vmul.f32 %v800_v12, %v1713_v44  ;;  %v894_v55 = vmul.f32 %v804_v48, %v1727_v34  ;;  %v1088_v12 = vadd.f32 %v1087_v0, %v1086_v22 }
 0x44b   :  { %v943_v23 = vsel %vm216_vm0, %v893_v57, 0.0  ;;  %v945_v9 = vsel %vm216_vm0, %v894_v55, 0.0 }
 0x44c   :  { %v1729_v1 = vpop.permute.xlu1 %829  ;;  %v789_v19 = vpop.permute.xlu0 %788  ;;  %v944_v30 = vadd.f32 %v943_v23, %v942_v7 }
 0x44d   :  { %v890_v32 = vmul.f32 %v789_v19, %v1727_v34  ;;  %v896_v19 = vmul.f32 %v1708_v11, %v1719_v51  ;;  %v1102_v11 = vrot.slane %v1101_v17, 1  ;;  %v901_v8 = vmul.f32 %v1729_v1, %v1713_v44 }
 0x44e   :  { %v946_v49 = vadd.f32 %v945_v9, %v944_v30  ;;  %v1124_v9 = vrot.slane %v1543_v24, 4 }
 0x44f   :  { %v932_v29 = vsel %vm216_vm0, %v890_v32, 0.0  ;;  %v955_v18 = vsel %vm216_vm0, %v896_v19, 0.0 }
 0x450   :  { %v793_v54 = vpop.permute.xlu1 %792  ;;  %v815_v14 = vpop.permute.xlu0 %814  ;;  %v933_v43 = vadd.f32 %v932_v29, %v931_v56 }
 0x451   :  { %v891_v31 = vmul.f32 %v793_v54, %v1737_v36  ;;  %v897_v25 = vmul.f32 %v815_v14, %v1713_v44  ;;  %v1089_v14 = vrot.slane %v1088_v12, 1 }
 0x453   :  { %v934_v20 = vsel %vm216_vm0, %v891_v31, 0.0  ;;  %v956_v56 = vsel %vm216_vm0, %v897_v25, 0.0  ;;  %v1090_v7 = vadd.f32 %v1089_v14, %v1088_v12  ;;  %v1248_v25 = vld [vmem:[%s1843_s3 + $0x38] sm:$0xff] }
 0x454   :  { %v935_v5 = vadd.f32 %v934_v20, %v933_v43  ;;  %v1754_v60 = vpop.permute.xlu1 %840  ;;  %v826_v40 = vpop.permute.xlu0 %825  ;;  %v1111_v43 = vrot.slane %v1524_v3, 4  ;;  %v957_v52 = vadd.f32 %v956_v56, %v955_v18 }
 0x455   :  { %v900_v58 = vmul.f32 %v826_v40, %v1719_v51 }
 0x456   :  { %v936_v59 = vrot.slane %v935_v5, 4 }
 0x457   :  { %v968_v1 = vsel %vm216_vm0, %v900_v58, 0.0 }
 0x458   :  { %v937_v50 = vadd.f32 %v936_v59, %v935_v5  ;;  %v808_v37 = vpop.permute.xlu1 %807  ;;  %v778_v4 = vpop.permute.xlu0 %777  ;;  %v1077_v5 = vadd.f32 %v1076_v39, %v1075_v35  ;;  %v1778_v59 = vadd.f32 %v1102_v11, %v1101_v17  ;;  %v1125_v39 = vadd.f32 %v1124_v9, %v1543_v24 }
 0x459   :  { %v895_v13 = vmul.f32 %v808_v37, %v1737_v36  ;;  %v887_v48 = vmul.f32 %v778_v4, %v1737_v36 }
 0x45a   :  { %v938_v28 = vrot.slane %v937_v50, 2 }
 0x45b   :  { %v947_v61 = vsel %vm216_vm0, %v895_v13, 0.0  ;;  %v921_v32 = vsel %vm216_vm0, %v887_v48, 0.0  ;;  %v1051_v13 = vmul.f32 %v1248_v25, %v1530_v62 }
 0x45c   :  { %v939_v46 = vadd.f32 %v938_v28, %v937_v50  ;;  %v948_v2 = vadd.f32 %v947_v61, %v946_v49  ;;  %v922_v33 = vadd.f32 %v921_v32, %v920_v15  ;;  %v1769_v57 = vpop.permute.xlu1 %855  ;;  %v819_v29 = vpop.permute.xlu0 %818  ;;  %v1112_v50 = vadd.f32 %v1111_v43, %v1524_v3 }
 0x45d   :  { %v898_v54 = vmul.f32 %v819_v29, %v1727_v34  ;;  %v1047_v3 = vmul.f32 %v1248_v25, %v1537_v41  ;;  %v969_v49 = vsel %vm216_vm0, %v901_v8, 0.0  ;;  %v904_v41 = vmul.f32 %v1754_v60, %v1719_v51 }
 0x45e   :  { %v949_v53 = vrot.slane %v948_v2, 4  ;;  %v923_v27 = vrot.slane %v922_v33, 4  ;;  %v940_v31 = vrot.slane %v939_v46, 1  ;;  %v970_v32 = vadd.f32 %v969_v49, %v968_v1 }
 0x45f   :  { %v958_v22 = vsel %vm216_vm0, %v898_v54, 0.0  ;;  %v1113_v26 = vrot.slane %v1112_v50, 2  ;;  %v1135_v11 = vsel %vm216_vm0, %v1047_v3, 0.0 }
 0x460   :  { %v950_v45 = vadd.f32 %v949_v53, %v948_v2  ;;  %v924_v23 = vadd.f32 %v923_v27, %v922_v33  ;;  %v823_v20 = vpop.permute.xlu1 %822  ;;  %v845_v38 = vpop.permute.xlu0 %844  ;;  %v959_v30 = vadd.f32 %v958_v22, %v957_v52  ;;  %v941_v16 = vadd.f32 %v940_v31, %v939_v46 }
 0x461   :  { %v899_v21 = vmul.f32 %v823_v20, %v1737_v36  ;;  %v905_v19 = vmul.f32 %v845_v38, %v1713_v44  ;;  %v1148_v22 = vsel %vm216_vm0, %v1051_v13, 0.0  ;;  %v1136_v38 = vadd.f32 %v1135_v11, %v1517_v42 }
 0x462   :  { %v951_v55 = vrot.slane %v950_v45, 2  ;;  %v925_v0 = vrot.slane %v924_v23, 2  ;;  %v1157_v17 = vadd.f32 %v1077_v5, %v941_v16 }
 0x463   :  { %v960_v6 = vsel %vm216_vm0, %v899_v21, 0.0  ;;  %v982_v18 = vsel %vm216_vm0, %v905_v19, 0.0  ;;  %v1114_v21 = vadd.f32 %v1113_v26, %v1112_v50 }
 0x464   :  { %v952_v63 = vadd.f32 %v951_v55, %v950_v45  ;;  %v926_v35 = vadd.f32 %v925_v0, %v924_v23  ;;  %v961_v37 = vadd.f32 %v960_v6, %v959_v30  ;;  %v1784_v40 = vpop.permute.xlu1 %870  ;;  %v834_v4 = vpop.permute.xlu0 %833  ;;  %1232 = vtanh.f32 %v1157_v17 }
 0x465   :  { %v902_v48 = vmul.f32 %v834_v4, %v1727_v34  ;;  %v981_v45 = vsel %vm216_vm0, %v904_v41, 0.0  ;;  %v1149_v30 = vadd.f32 %v1148_v22, %v1540_v47  ;;  %v1115_v13 = vrot.slane %v1114_v21, 1 }
 0x466   :  { %v953_v12 = vrot.slane %v952_v63, 1  ;;  %v927_v15 = vrot.slane %v926_v35, 1  ;;  %v962_v28 = vrot.slane %v961_v37, 4  ;;  %v983_v5 = vadd.f32 %v982_v18, %v981_v45 }
 0x467   :  { %v971_v61 = vsel %vm216_vm0, %v902_v48, 0.0  ;;  %v1150_v47 = vrot.slane %v1149_v30, 4  ;;  %v912_v26 = vmul.f32 %v1784_v40, %v1719_v51 }
 0x468   :  { %v954_v46 = vadd.f32 %v953_v12, %v952_v63  ;;  %v928_v2 = vadd.f32 %v927_v15, %v926_v35  ;;  %v963_v62 = vadd.f32 %v962_v28, %v961_v37  ;;  %v838_v33 = vpop.permute.xlu1 %837  ;;  %v860_v29 = vpop.permute.xlu0 %859  ;;  %v972_v27 = vadd.f32 %v971_v61, %v970_v32 }
 0x469   :  { %v903_v56 = vmul.f32 %v838_v33, %v1737_v36  ;;  %v909_v55 = vmul.f32 %v860_v29, %v1713_v44  ;;  %v908_v35 = vmul.f32 %v1769_v57, %v1719_v51  ;;  %v1137_v37 = vrot.slane %v1136_v38, 4 }
 0x46a   :  { %v1158_v54 = vadd.f32 %v1090_v7, %v954_v46  ;;  %v1156_v14 = vadd.f32 %v1064_v10, %v928_v2  ;;  %v964_v53 = vrot.slane %v963_v62, 2  ;;  %v1126_v7 = vrot.slane %v1125_v39, 2 }
 0x46b   :  { %v973_v31 = vsel %vm216_vm0, %v903_v56, 0.0  ;;  %v995_v48 = vsel %vm216_vm0, %v909_v55, 0.0  ;;  %v994_v57 = vsel %vm216_vm0, %v908_v35, 0.0  ;;  %v1138_v61 = vadd.f32 %v1137_v37, %v1136_v38 }
 0x46c   :  { %1234 = vtanh.f32 %v1158_v54  ;;  %v965_v24 = vadd.f32 %v964_v53, %v963_v62  ;;  %v974_v43 = vadd.f32 %v973_v31, %v972_v27  ;;  %v853_v52 = vpop.permute.xlu1 %852  ;;  %v849_v60 = vpop.permute.xlu0 %848  ;;  %v1127_v1 = vadd.f32 %v1126_v7, %v1125_v39 }
 0x46d   :  { %1236 = vtanh.f32 %v1156_v14  ;;  %v907_v23 = vmul.f32 %v853_v52, %v1737_v36  ;;  %v906_v20 = vmul.f32 %v849_v60, %v1727_v34  ;;  %v996_v46 = vadd.f32 %v995_v48, %v994_v57 }
 0x46e   :  { %v966_v10 = vrot.slane %v965_v24, 1  ;;  %v975_v58 = vrot.slane %v974_v43, 4  ;;  %v1233_v28 = vpop.eup %1232  ;;  %v1116_v33 = vadd.f32 %v1115_v13, %v1114_v21  ;;  %v1128_v29 = vrot.slane %v1127_v1, 1 }
 0x46f   :  { %v984_v0 = vsel %vm216_vm0, %v906_v20, 0.0  ;;  %v986_v42 = vsel %vm216_vm0, %v907_v23, 0.0  ;;  %v1139_v31 = vrot.slane %v1138_v61, 2  ;;  %v1151_v40 = vadd.f32 %v1150_v47, %v1149_v30 }
 0x470   :  { %v967_v8 = vadd.f32 %v966_v10, %v965_v24  ;;  %v976_v16 = vadd.f32 %v975_v58, %v974_v43  ;;  %v985_v6 = vadd.f32 %v984_v0, %v983_v5  ;;  %v875_v63 = vpop.permute.xlu0 %874  ;;  %v868_v25 = vpop.permute.xlu1 %867  ;;  %v1007_v43 = vsel %vm216_vm0, %v912_v26, 0.0 }
 0x471   :  { %v911_v49 = vmul.f32 %v868_v25, %v1737_v36  ;;  %v913_v17 = vmul.f32 %v875_v63, %v1713_v44  ;;  %v1129_v38 = vadd.f32 %v1128_v29, %v1127_v1  ;;  %v1140_v58 = vadd.f32 %v1139_v31, %v1138_v61 }
 0x472   :  { %v1159_v4 = vadd.f32 %v1778_v59, %v967_v8  ;;  %v977_v50 = vrot.slane %v976_v16, 2  ;;  %v987_v9 = vadd.f32 %v986_v42, %v985_v6  ;;  %v1152_v30 = vrot.slane %v1151_v40, 2 }
 0x473   :  { %v999_v27 = vsel %vm216_vm0, %v911_v49, 0.0  ;;  %v1008_v11 = vsel %vm216_vm0, %v913_v17, 0.0  ;;  %v1141_v63 = vrot.slane %v1140_v58, 1 }
 0x474   :  { %1238 = vtanh.f32 %v1159_v4  ;;  %v978_v3 = vadd.f32 %v977_v50, %v976_v16  ;;  %v988_v12 = vrot.slane %v987_v9, 4  ;;  %v864_v15 = vpop.permute.xlu0 %863  ;;  %v1009_v45 = vadd.f32 %v1008_v11, %v1007_v43 }
 0x475   :  { %v910_v59 = vmul.f32 %v864_v15, %v1727_v34  ;;  %v1153_v37 = vadd.f32 %v1152_v30, %v1151_v40 }
 0x476   :  { %v1235_v19 = vpop.eup %1234  ;;  %v979_v32 = vrot.slane %v978_v3, 1  ;;  %v989_v2 = vadd.f32 %v988_v12, %v987_v9  ;;  %v1142_v9 = vadd.f32 %v1141_v63, %v1140_v58 }
 0x477   :  { %v1237_v62 = vpop.eup %1236  ;;  %v997_v39 = vsel %vm216_vm0, %v910_v59, 0.0  ;;  %v1154_v48 = vrot.slane %v1153_v37, 1 }
 0x478   :  { %v1180_v41 = vsel %vm395_vm1, %v1233_v28, %v1237_v62  ;;  %v980_v56 = vadd.f32 %v979_v32, %v978_v3  ;;  %v990_v54 = vrot.slane %v989_v2, 2  ;;  %v998_v44 = vadd.f32 %v997_v39, %v996_v46  ;;  %v879_v14 = vpop.permute.xlu0 %878 }
 0x479   :  { %v1181_v53 = vsel %vm397_vm2, %v1235_v19, %v1180_v41  ;;  %v914_v18 = vmul.f32 %v879_v14, %v1727_v34  ;;  %v1155_v28 = vadd.f32 %v1154_v48, %v1153_v37 }
 0x47a   :  { %v1160_v22 = vadd.f32 %v1116_v33, %v980_v56  ;;  %v991_v24 = vadd.f32 %v990_v54, %v989_v2  ;;  %v1000_v51 = vadd.f32 %v999_v27, %v998_v44 }
 0x47b   :  { %v1010_v52 = vsel %vm216_vm0, %v914_v18, 0.0 }
 0x47c   :  { %1240 = vtanh.f32 %v1160_v22  ;;  %v992_v60 = vrot.slane %v991_v24, 1  ;;  %v1001_v23 = vrot.slane %v1000_v51, 4  ;;  %v883_v20 = vpop.permute.xlu0 %882  ;;  %v1011_v7 = vadd.f32 %v1010_v52, %v1009_v45 }
 0x47d   :  { %v915_v10 = vmul.f32 %v883_v20, %v1737_v36 }
 0x47e   :  { %v1239_v5 = vpop.eup %1238  ;;  %v993_v34 = vadd.f32 %v992_v60, %v991_v24  ;;  %v1002_v21 = vadd.f32 %v1001_v23, %v1000_v51 }
 0x47f   :  { %v1182_v55 = vsel %vm399_vm3, %v1239_v5, %v1181_v53  ;;  %v1012_v0 = vsel %vm216_vm0, %v915_v10, 0.0 }
 0x480   :  { %v1161_v8 = vadd.f32 %v1129_v38, %v993_v34  ;;  %v1003_v16 = vrot.slane %v1002_v21, 2  ;;  %v1013_v6 = vadd.f32 %v1012_v0, %v1011_v7 }
 0x482   :  { %1242 = vtanh.f32 %v1161_v8  ;;  %v1004_v35 = vadd.f32 %v1003_v16, %v1002_v21  ;;  %v1014_v42 = vrot.slane %v1013_v6, 4 }
 0x484   :  { %v1005_v4 = vrot.slane %v1004_v35, 1  ;;  %v1015_v36 = vadd.f32 %v1014_v42, %v1013_v6 }
 0x486   :  { %v1241_v50 = vpop.eup %1240  ;;  %v1006_v25 = vadd.f32 %v1005_v4, %v1004_v35  ;;  %v1016_v13 = vrot.slane %v1015_v36, 2 }
 0x487   :  { %v1183_v1 = vsel %vm401_vm4, %v1241_v50, %v1182_v55 }
 0x488   :  { %v1162_v47 = vadd.f32 %v1142_v9, %v1006_v25  ;;  %v1017_v3 = vadd.f32 %v1016_v13, %v1015_v36 }
 0x48a   :  { %1244 = vtanh.f32 %v1162_v47  ;;  %v1018_v12 = vrot.slane %v1017_v3, 1 }
 0x48c   :  { %v1243_v15 = vpop.eup %1242  ;;  %v1019_v57 = vadd.f32 %v1018_v12, %v1017_v3 }
 0x48d   :  { %v1184_v49 = vsel %vm403_vm5, %v1243_v15, %v1183_v1 }
 0x48e   :  { %v1163_v17 = vadd.f32 %v1155_v28, %v1019_v57 }
 0x490   :  { %1246 = vtanh.f32 %v1163_v17 }
 0x494   :  { %v1245_v59 = vpop.eup %1244 }
 0x495   :  { %v1185_v19 = vsel %vm405_vm6, %v1245_v59, %v1184_v49 }
 0x49a   :  { %v1247_v61 = vpop.eup %1246 }
 0x49b   :  { %v1186_v32 = vsel %vm407_vm7, %v1247_v61, %v1185_v19 }
 0x49c   :  { %1188 = vst.msk [vmem:[%s1847_s4] sm:$0xff] %vm216_vm0, %v1186_v32 }

</bundles_post_ra>
